<compile_context>
chip_gen: v7x
topology: tpu7x:2x2x1
jax: 0.10.0
libtpu: 0.0.40
codegen_flags: <defaults>
</compile_context>

<pallas_src>
import functools

import jax
import jax.numpy as jnp
from jax import lax
from jax.experimental import pallas as pl
from jax.experimental.pallas import tpu as pltpu


_VMEM_LIMIT = 32 * 1024 * 1024  # explicit; valid on v5e/v6e (128 MiB) and v7x (64 MiB)


# ---------------------------------------------------------------------------
# Pallas kernel 1: (im2col patches) x (fused weight matrix) + spike threshold
# ---------------------------------------------------------------------------
def _conv_fire_kernel(p_ref, w_ref, o_ref, *, threshold):
    # p_ref: (1, TL, CK)   w_ref: (CK, Cout)   o_ref: (1, TL, Cout)
    pot = jnp.dot(p_ref[0], w_ref[...], preferred_element_type=jnp.float32)
    o_ref[0] = (pot >= threshold).astype(o_ref.dtype)


def conv_fire(patches, w_mat, threshold):
    """patches: (B, L, CK), w_mat: (CK, Cout) -> 0/1 spikes (B, L, Cout)."""
    B, L, CK = patches.shape
    Cout = w_mat.shape[1]
    TL = 128 if L % 128 == 0 else L          # tile rows when possible (pipeline / megacore)
    return pl.pallas_call(
        functools.partial(_conv_fire_kernel, threshold=float(threshold)),
        out_shape=jax.ShapeDtypeStruct((B, L, Cout), jnp.float32),
        grid=(B, L // TL),
        in_specs=[
            pl.BlockSpec((1, TL, CK), lambda b, l: (b, l, 0)),
            pl.BlockSpec((CK, Cout), lambda b, l: (0, 0)),
        ],
        out_specs=pl.BlockSpec((1, TL, Cout), lambda b, l: (b, l, 0)),
        compiler_params=pltpu.CompilerParams(
            dimension_semantics=("parallel", "parallel"),
            vmem_limit_bytes=_VMEM_LIMIT),
    )(patches, w_mat)


# ---------------------------------------------------------------------------
# Pallas kernel 2: attention + output projection (heads == 1), fully fused
# ---------------------------------------------------------------------------
def _attn_kernel(qkv_ref, wo_ref, bo_ref, o_ref, *, scale):
    # qkv_ref: (3, 1, N, D) = q/k/v for the current batch element
    q = qkv_ref[0, 0] * scale                      # fold scale into q: N*D mul, not N*N
    k = qkv_ref[1, 0]
    v = qkv_ref[2, 0]
    # contract last axes directly -> no explicit XLU transpose of k
    dots = lax.dot_general(q, k, (((1,), (1,)), ((), ())),
                           preferred_element_type=jnp.float32)          # (N, N)
    m = jnp.max(dots, axis=-1, keepdims=True)
    e = jnp.exp(dots - m)
    denom = jnp.sum(e, axis=-1, keepdims=True)
    out = jnp.dot(e, v, preferred_element_type=jnp.float32)             # (N, D)
    out = out * pl.reciprocal(denom, approx=True)  # EUP reciprocal, applied at N*D not N*N
    proj = jnp.dot(out, wo_ref[...], preferred_element_type=jnp.float32) + bo_ref[...]
    o_ref[0] = proj.astype(o_ref.dtype)


def attention_project(qkv, w_out, b_out, scale):
    """qkv: (3, B, N, D)  ->  (B, N, dim_out)."""
    _, B, N, D = qkv.shape
    dim_out = w_out.shape[1]
    return pl.pallas_call(
        functools.partial(_attn_kernel, scale=float(scale)),
        out_shape=jax.ShapeDtypeStruct((B, N, dim_out), jnp.float32),
        grid=(B,),
        in_specs=[
            pl.BlockSpec((3, 1, N, D), lambda b: (0, b, 0, 0)),
            pl.BlockSpec((D, dim_out), lambda b: (0, 0)),
            pl.BlockSpec((1, dim_out), lambda b: (0, 0)),
        ],
        out_specs=pl.BlockSpec((1, N, dim_out), lambda b: (b, 0, 0)),
        compiler_params=pltpu.CompilerParams(
            dimension_semantics=("parallel",),
            vmem_limit_bytes=_VMEM_LIMIT),
    )(qkv, w_out, b_out)


# ---------------------------------------------------------------------------
# Plain-JAX glue (all sequence-major / NHWC)
# ---------------------------------------------------------------------------
def _im2col_nhwc(x, k):
    """x: (B, H, W, C) -> (B, Ho*Wo, C*k*k); inner index = c*k*k + di*k + dj
    (matches torch Conv2d weight (Cout, Cin, K, K) flattening)."""
    B, H, W, C = x.shape
    Ho, Wo = H - k + 1, W - k + 1
    cols = [x[:, di:di + Ho, dj:dj + Wo, :] for di in range(k) for dj in range(k)]
    p = jnp.stack(cols, axis=-1)                         # (B, Ho, Wo, C, k*k)
    return p.reshape(B, Ho * Wo, C * k * k), (Ho, Wo)


def _max_pool_nhwc(x, k, s, p):
    # torch F.max_pool2d semantics (implicit -inf padding, floor mode)
    return lax.reduce_window(
        x, -jnp.inf, lax.max,
        window_dimensions=(1, k, k, 1),
        window_strides=(1, s, s, 1),
        padding=((0, 0), (p, p), (p, p), (0, 0)))


def _conv_w_matrix(w):
    """torch conv weight (Cout, Cin, K, K) -> (Cin*K*K, Cout) matmul weight."""
    return w.reshape(w.shape[0], -1).T


def _block_diag(mats):
    rows = sum(m.shape[0] for m in mats)
    cols = sum(m.shape[1] for m in mats)
    out = jnp.zeros((rows, cols), mats[0].dtype)
    r = c = 0
    for m in mats:
        out = out.at[r:r + m.shape[0], c:c + m.shape[1]].set(m)
        r += m.shape[0]
        c += m.shape[1]
    return out


def qkv_from_convs(x, params, img_size):
    """Fused q|k|v SepConv2d eval forward. Returns (qkv, aux): qkv is (3, B, N, Dh)."""
    B, n, dim = x.shape
    dh = params["q_w1"].shape[0]
    # rearrange 'b (l w) n -> b l w n' : channel already last -> pure reshape, no transpose
    x_img = x.reshape(B, img_size, img_size, dim)

    # --- stage 1: conv1 (k=5) for q|k|v in ONE call (shared patches) + fire(t=10) ---
    xp = jnp.pad(x_img, ((0, 0), (2, 2), (2, 2), (0, 0)))       # sf.pad(..., (2,2,2,2), 0)
    p1, (h1, w1) = _im2col_nhwc(xp, 5)
    w1_mat = jnp.concatenate(
        [_conv_w_matrix(params[f"{t}_w1"]) for t in ("q", "k", "v")], axis=1)   # (CK1, 3*Dh)
    spk1 = conv_fire(p1, w1_mat, threshold=10.0)                # (B, L1, 3*Dh)

    # --- pool + zero pad (0/1 spikes: -inf-pad max-pool == torch semantics) ---
    spk1_img = spk1.reshape(B, h1, w1, 3 * dh)
    pooled = _max_pool_nhwc(spk1_img, 2, 2, 1)                  # sf.pooling(spk, 2, 2, 1)
    spk_in = jnp.pad(pooled, ((0, 0), (1, 1), (1, 1), (0, 0)))  # sf.pad(..., (x,)*4)

    # --- stage 2: conv2 (k=2) for q|k|v as ONE block-diagonal matmul + fire(t=1) ---
    p2, (h2, w2) = _im2col_nhwc(spk_in, 2)
    w2_mat = _block_diag(
        [_conv_w_matrix(params[f"{t}_w2"]) for t in ("q", "k", "v")])           # (3*Dh*4, 3*Dh)
    spk2 = conv_fire(p2, w2_mat, threshold=1.0)                 # (B, L2, 3*Dh)

    # --- final pool -> sequence-major q|k|v ---
    spk2_img = spk2.reshape(B, h2, w2, 3 * dh)
    spk_out = _max_pool_nhwc(spk2_img, 2, 2, 1)                 # (B, Hf, Wf, 3*Dh)
    N = spk_out.shape[1] * spk_out.shape[2]
    qkv = spk_out.reshape(B, N, 3, dh).transpose(2, 0, 1, 3)    # (3, B, N, Dh)

    aux = dict(p1=p1, w1_mat=w1_mat, spk1=spk1, p2=p2, w2_mat=w2_mat, spk2=spk2)
    return qkv, aux


def conv_attention_forward(x, params, img_size, dim_head):
    """x: (b, n, dim), n == img_size**2. eval mode, last_stage=False, heads==1."""
    qkv, _ = qkv_from_convs(x, params, img_size)
    scale = dim_head ** -0.5
    # einsum attention + softmax + einsum + Linear (Dropout identity in eval), one kernel
    return attention_project(qkv, params["out_w"], params["out_b"], scale)


def init_params(key, dim, dim_head, heads):
    self_heads = 1                                   # module hardcodes self.heads = 1
    inner_dim = dim_head * self_heads
    keys = jax.random.split(key, 8)

    def conv_w(k, cout, cin, ksz):                   # snn.Convolution: N(0.8, 0.05)
        return 0.8 + 0.05 * jax.random.normal(k, (cout, cin, ksz, ksz), jnp.float32)

    params = {
        "q_w1": conv_w(keys[0], inner_dim, dim, 5),
        "q_w2": conv_w(keys[1], inner_dim, inner_dim, 2),
        "k_w1": conv_w(keys[2], inner_dim, dim, 5),
        "k_w2": conv_w(keys[3], inner_dim, inner_dim, 2),
        "v_w1": conv_w(keys[4], inner_dim, dim, 5),
        "v_w2": conv_w(keys[5], inner_dim, inner_dim, 2),
    }
    project_out = not (heads == 1 and dim_head == dim)
    if project_out:
        lim = 1.0 / (inner_dim ** 0.5)
        params["out_w"] = jax.random.uniform(keys[6], (inner_dim, dim), jnp.float32, -lim, lim)
        params["out_b"] = jax.random.uniform(keys[7], (1, dim), jnp.float32, -lim, lim)
    else:  # nn.Identity()
        params["out_w"] = jnp.eye(inner_dim, dtype=jnp.float32)
        params["out_b"] = jnp.zeros((1, inner_dim), jnp.float32)
    return params


if __name__ == "__main__":
    B, img_size, dim, dim_head, heads = 2, 16, 4, 8, 1
    n = img_size * img_size

    key = jax.random.PRNGKey(0)
    kx, kp = jax.random.split(key)
    # binary spike-train-like input, deterministic
    x = (jax.random.uniform(kx, (B, n, dim)) > 0.5).astype(jnp.float32)
    params = init_params(kp, dim, dim_head, heads)

    fwd = jax.jit(functools.partial(conv_attention_forward,
                                    img_size=img_size, dim_head=dim_head))
    out = jax.block_until_ready(fwd(x, params))

    # ---------------- correctness checks --------------------------------------
    qkv, aux = qkv_from_convs(x, params, img_size)

    # (a) fused conv+fire kernels vs. plain-JAX im2col matmul reference.
    #     Ignore pixels whose reference potential sits within 1e-3 of the firing
    #     threshold (FP summation order may legitimately flip the exact >= compare).
    def check_spikes(spk, p, w_mat, thr):
        pot = jnp.einsum("blc,cd->bld", p, w_mat, precision=lax.Precision.HIGHEST)
        ref = (pot >= thr).astype(jnp.float32)
        ok = (spk == ref) | (jnp.abs(pot - thr) < 1e-3)
        assert bool(jnp.all(ok))

    check_spikes(aux["spk1"], aux["p1"], aux["w1_mat"], 10.0)
    check_spikes(aux["spk2"], aux["p2"], aux["w2_mat"], 1.0)

    # (b) fused attention+projection kernel vs. plain-JAX reference on the same q/k/v.
    q, k, v = qkv[0], qkv[1], qkv[2]
    scale = dim_head ** -0.5
    dots = jnp.einsum("bid,bjd->bij", q, k, precision=lax.Precision.HIGHEST) * scale
    attn = jax.nn.softmax(dots, axis=-1)
    ref_out = jnp.einsum("bij,bjd->bid", attn, v,
                         precision=lax.Precision.HIGHEST) @ params["out_w"] + params["out_b"]
    assert out.shape == ref_out.shape
    assert bool(jnp.all(jnp.isfinite(out)))
    assert jnp.allclose(out, ref_out, rtol=2e-2, atol=2e-2)

    print("KERNEL_OK")
</pallas_src>

<mosaic_0001>
module attributes {stable_mosaic.version = 11 : i64} {
  func.func @_conv_fire_kernel(%arg0: i32, %arg1: i32, %arg2: memref<1x128x100xf32, #tpu.memory_space<vmem>>, %arg3: memref<100x24xf32, #tpu.memory_space<vmem>>, %arg4: memref<1x128x24xf32, #tpu.memory_space<vmem>>) attributes {dimension_semantics = [#tpu.dimension_semantics<parallel>, #tpu.dimension_semantics<parallel>], iteration_bounds = array<i64: 2, 2>, scalar_prefetch = 0 : i64, scratch_operands = 0 : i64, tpu.core_type = #tpu.core_type<tc>, window_params = [{transform_indices = @transform_0, window_bounds = array<i64: 1, 128, 100>}, {pipeline_mode = #tpu.pipeline_mode<synchronous>, transform_indices = @transform_1, window_bounds = array<i64: 100, 24>}, {transform_indices = @transform_2, window_bounds = array<i64: 1, 128, 24>}]} {
    %c0 = arith.constant 0 : index
    %c0_0 = arith.constant 0 : index
    %c0_1 = arith.constant 0 : index
    %0 = vector.load %arg2[%c0, %c0_0, %c0_1] : memref<1x128x100xf32, #tpu.memory_space<vmem>>, vector<1x128x100xf32>
    %1 = vector.shape_cast %0 : vector<1x128x100xf32> to vector<128x100xf32>
    %c0_2 = arith.constant 0 : index
    %c0_3 = arith.constant 0 : index
    %2 = vector.load %arg3[%c0_2, %c0_3] : memref<100x24xf32, #tpu.memory_space<vmem>>, vector<100x24xf32>
    %cst = arith.constant dense<0.000000e+00> : vector<128x24xf32>
    %3 = tpu.matmul %1, %2, %cst {dimension_numbers = #tpu.dot_dimension_numbers<[1], [0], [0], [1], [0, 0, 1, 1], [], []>} : vector<128x100xf32>, vector<100x24xf32>, vector<128x24xf32> -> vector<128x24xf32>
    %cst_4 = arith.constant 1.000000e+01 : f32
    %4 = vector.broadcast %cst_4 : f32 to vector<128x24xf32>
    %5 = arith.cmpf oge, %3, %4 : vector<128x24xf32>
    %6 = arith.extui %5 : vector<128x24xi1> to vector<128x24xi32>
    %7 = arith.sitofp %6 : vector<128x24xi32> to vector<128x24xf32>
    %c0_5 = arith.constant 0 : index
    %c0_6 = arith.constant 0 : index
    %c0_7 = arith.constant 0 : index
    %8 = vector.load %arg4[%c0_5, %c0_6, %c0_7] : memref<1x128x24xf32, #tpu.memory_space<vmem>>, vector<1x128x24xf32>
    %9 = vector.shape_cast %8 : vector<1x128x24xf32> to vector<128x24xf32>
    %10 = vector.shape_cast %7 : vector<128x24xf32> to vector<1x128x24xf32>
    tpu.vector_store %arg4[%c0_5, %c0_6, %c0_7], %10 {strides = array<i32>} : memref<1x128x24xf32, #tpu.memory_space<vmem>>, vector<1x128x24xf32>,
    return
  }
  func.func @transform_0(%arg0: i32, %arg1: i32) -> (i32, i32, i32) {
    %c0_i32 = arith.constant 0 : i32
    %c0_i32_0 = arith.constant 0 : i32
    return %arg0, %arg1, %c0_i32 : i32, i32, i32
  }
  func.func @transform_1(%arg0: i32, %arg1: i32) -> (i32, i32) {
    %c0_i32 = arith.constant 0 : i32
    %c0_i32_0 = arith.constant 0 : i32
    %c0_i32_1 = arith.constant 0 : i32
    return %c0_i32, %c0_i32_0 : i32, i32
  }
  func.func @transform_2(%arg0: i32, %arg1: i32) -> (i32, i32, i32) {
    %c0_i32 = arith.constant 0 : i32
    %c0_i32_0 = arith.constant 0 : i32
    return %arg0, %arg1, %c0_i32 : i32, i32, i32
  }
}

module attributes {stable_mosaic.version = 11 : i64} {
  func.func @_conv_fire_kernel(%arg0: i32, %arg1: i32, %arg2: memref<1x100x96xf32, #tpu.memory_space<vmem>>, %arg3: memref<96x24xf32, #tpu.memory_space<vmem>>, %arg4: memref<1x100x24xf32, #tpu.memory_space<vmem>>) attributes {dimension_semantics = [#tpu.dimension_semantics<parallel>, #tpu.dimension_semantics<parallel>], iteration_bounds = array<i64: 2, 1>, scalar_prefetch = 0 : i64, scratch_operands = 0 : i64, tpu.core_type = #tpu.core_type<tc>, window_params = [{transform_indices = @transform_0, window_bounds = array<i64: 1, 100, 96>}, {pipeline_mode = #tpu.pipeline_mode<synchronous>, transform_indices = @transform_1, window_bounds = array<i64: 96, 24>}, {transform_indices = @transform_2, window_bounds = array<i64: 1, 100, 24>}]} {
    %c0 = arith.constant 0 : index
    %c0_0 = arith.constant 0 : index
    %c0_1 = arith.constant 0 : index
    %0 = vector.load %arg2[%c0, %c0_0, %c0_1] : memref<1x100x96xf32, #tpu.memory_space<vmem>>, vector<1x100x96xf32>
    %1 = vector.shape_cast %0 : vector<1x100x96xf32> to vector<100x96xf32>
    %c0_2 = arith.constant 0 : index
    %c0_3 = arith.constant 0 : index
    %2 = vector.load %arg3[%c0_2, %c0_3] : memref<96x24xf32, #tpu.memory_space<vmem>>, vector<96x24xf32>
    %cst = arith.constant dense<0.000000e+00> : vector<100x24xf32>
    %3 = tpu.matmul %1, %2, %cst {dimension_numbers = #tpu.dot_dimension_numbers<[1], [0], [0], [1], [0, 0, 1, 1], [], []>} : vector<100x96xf32>, vector<96x24xf32>, vector<100x24xf32> -> vector<100x24xf32>
    %cst_4 = arith.constant 1.000000e+00 : f32
    %4 = vector.broadcast %cst_4 : f32 to vector<100x24xf32>
    %5 = arith.cmpf oge, %3, %4 : vector<100x24xf32>
    %6 = arith.extui %5 : vector<100x24xi1> to vector<100x24xi32>
    %7 = arith.sitofp %6 : vector<100x24xi32> to vector<100x24xf32>
    %c0_5 = arith.constant 0 : index
    %c0_6 = arith.constant 0 : index
    %c0_7 = arith.constant 0 : index
    %8 = vector.load %arg4[%c0_5, %c0_6, %c0_7] : memref<1x100x24xf32, #tpu.memory_space<vmem>>, vector<1x100x24xf32>
    %9 = vector.shape_cast %8 : vector<1x100x24xf32> to vector<100x24xf32>
    %10 = vector.shape_cast %7 : vector<100x24xf32> to vector<1x100x24xf32>
    tpu.vector_store %arg4[%c0_5, %c0_6, %c0_7], %10 {strides = array<i32>} : memref<1x100x24xf32, #tpu.memory_space<vmem>>, vector<1x100x24xf32>,
    return
  }
  func.func @transform_0(%arg0: i32, %arg1: i32) -> (i32, i32, i32) {
    %c0_i32 = arith.constant 0 : i32
    %c0_i32_0 = arith.constant 0 : i32
    return %arg0, %arg1, %c0_i32 : i32, i32, i32
  }
  func.func @transform_1(%arg0: i32, %arg1: i32) -> (i32, i32) {
    %c0_i32 = arith.constant 0 : i32
    %c0_i32_0 = arith.constant 0 : i32
    %c0_i32_1 = arith.constant 0 : i32
    return %c0_i32, %c0_i32_0 : i32, i32
  }
  func.func @transform_2(%arg0: i32, %arg1: i32) -> (i32, i32, i32) {
    %c0_i32 = arith.constant 0 : i32
    %c0_i32_0 = arith.constant 0 : i32
    return %arg0, %arg1, %c0_i32 : i32, i32, i32
  }
}

module attributes {stable_mosaic.version = 11 : i64} {
  func.func @_attn_kernel(%arg0: i32, %arg1: memref<3x1x36x8xf32, #tpu.memory_space<vmem>>, %arg2: memref<8x4xf32, #tpu.memory_space<vmem>>, %arg3: memref<1x4xf32, #tpu.memory_space<vmem>>, %arg4: memref<1x36x4xf32, #tpu.memory_space<vmem>>) attributes {dimension_semantics = [#tpu.dimension_semantics<parallel>], iteration_bounds = array<i64: 2>, scalar_prefetch = 0 : i64, scratch_operands = 0 : i64, tpu.core_type = #tpu.core_type<tc>, window_params = [{transform_indices = @transform_0, window_bounds = array<i64: 3, 1, 36, 8>}, {pipeline_mode = #tpu.pipeline_mode<synchronous>, transform_indices = @transform_1, window_bounds = array<i64: 8, 4>}, {pipeline_mode = #tpu.pipeline_mode<synchronous>, transform_indices = @transform_2, window_bounds = array<i64: 1, 4>}, {transform_indices = @transform_3, window_bounds = array<i64: 1, 36, 4>}]} {
    %c0 = arith.constant 0 : index
    %c0_0 = arith.constant 0 : index
    %c0_1 = arith.constant 0 : index
    %c0_2 = arith.constant 0 : index
    %0 = vector.load %arg1[%c0, %c0_0, %c0_1, %c0_2] : memref<3x1x36x8xf32, #tpu.memory_space<vmem>>, vector<1x1x36x8xf32>
    %1 = vector.shape_cast %0 : vector<1x1x36x8xf32> to vector<36x8xf32>
    %cst = arith.constant 0.353553385 : f32
    %2 = vector.broadcast %cst : f32 to vector<36x8xf32>
    %3 = arith.mulf %1, %2 : vector<36x8xf32>
    %c1 = arith.constant 1 : index
    %c0_3 = arith.constant 0 : index
    %c0_4 = arith.constant 0 : index
    %c0_5 = arith.constant 0 : index
    %4 = vector.load %arg1[%c1, %c0_3, %c0_4, %c0_5] : memref<3x1x36x8xf32, #tpu.memory_space<vmem>>, vector<1x1x36x8xf32>
    %5 = vector.shape_cast %4 : vector<1x1x36x8xf32> to vector<36x8xf32>
    %c2 = arith.constant 2 : index
    %c0_6 = arith.constant 0 : index
    %c0_7 = arith.constant 0 : index
    %c0_8 = arith.constant 0 : index
    %6 = vector.load %arg1[%c2, %c0_6, %c0_7, %c0_8] : memref<3x1x36x8xf32, #tpu.memory_space<vmem>>, vector<1x1x36x8xf32>
    %7 = vector.shape_cast %6 : vector<1x1x36x8xf32> to vector<36x8xf32>
    %cst_9 = arith.constant dense<0.000000e+00> : vector<36x36xf32>
    %8 = tpu.matmul %3, %5, %cst_9 {dimension_numbers = #tpu.dot_dimension_numbers<[1], [1], [0], [0], [0, 0, 1, 0], [], []>} : vector<36x8xf32>, vector<36x8xf32>, vector<36x36xf32> -> vector<36x36xf32>
    %cst_10 = arith.constant dense<0xFF800000> : vector<36xf32>
    %9 = vector.multi_reduction <maximumf>, %8, %cst_10 [1] : vector<36x36xf32> to vector<36xf32>
    %10 = vector.shape_cast %9 : vector<36xf32> to vector<36x1xf32>
    %11 = vector.broadcast %10 : vector<36x1xf32> to vector<36x36xf32>
    %12 = arith.subf %8, %11 : vector<36x36xf32>
    %13 = math.exp %12 : vector<36x36xf32>
    %cst_11 = arith.constant dense<0.000000e+00> : vector<36xf32>
    %14 = vector.multi_reduction <add>, %13, %cst_11 [1] : vector<36x36xf32> to vector<36xf32>
    %15 = vector.shape_cast %14 : vector<36xf32> to vector<36x1xf32>
    %cst_12 = arith.constant dense<0.000000e+00> : vector<36x8xf32>
    %16 = tpu.matmul %13, %7, %cst_12 {dimension_numbers = #tpu.dot_dimension_numbers<[1], [0], [0], [1], [0, 0, 1, 1], [], []>} : vector<36x36xf32>, vector<36x8xf32>, vector<36x8xf32> -> vector<36x8xf32>
    %17 = tpu.reciprocal %15 {approx = true} : vector<36x1xf32> -> vector<36x1xf32>
    %18 = vector.broadcast %17 : vector<36x1xf32> to vector<36x8xf32>
    %19 = arith.mulf %16, %18 : vector<36x8xf32>
    %c0_13 = arith.constant 0 : index
    %c0_14 = arith.constant 0 : index
    %20 = vector.load %arg2[%c0_13, %c0_14] : memref<8x4xf32, #tpu.memory_space<vmem>>, vector<8x4xf32>
    %cst_15 = arith.constant dense<0.000000e+00> : vector<36x4xf32>
    %21 = tpu.matmul %19, %20, %cst_15 {dimension_numbers = #tpu.dot_dimension_numbers<[1], [0], [0], [1], [0, 0, 1, 1], [], []>} : vector<36x8xf32>, vector<8x4xf32>, vector<36x4xf32> -> vector<36x4xf32>
    %c0_16 = arith.constant 0 : index
    %c0_17 = arith.constant 0 : index
    %22 = vector.load %arg3[%c0_16, %c0_17] : memref<1x4xf32, #tpu.memory_space<vmem>>, vector<1x4xf32>
    %23 = vector.broadcast %22 : vector<1x4xf32> to vector<36x4xf32>
    %24 = arith.addf %21, %23 : vector<36x4xf32>
    %c0_18 = arith.constant 0 : index
    %c0_19 = arith.constant 0 : index
    %c0_20 = arith.constant 0 : index
    %25 = vector.load %arg4[%c0_18, %c0_19, %c0_20] : memref<1x36x4xf32, #tpu.memory_space<vmem>>, vector<1x36x4xf32>
    %26 = vector.shape_cast %25 : vector<1x36x4xf32> to vector<36x4xf32>
    %27 = vector.shape_cast %24 : vector<36x4xf32> to vector<1x36x4xf32>
    tpu.vector_store %arg4[%c0_18, %c0_19, %c0_20], %27 {strides = array<i32>} : memref<1x36x4xf32, #tpu.memory_space<vmem>>, vector<1x36x4xf32>,
    return
  }
  func.func @transform_0(%arg0: i32) -> (i32, i32, i32, i32) {
    %c0_i32 = arith.constant 0 : i32
    %c0_i32_0 = arith.constant 0 : i32
    %c0_i32_1 = arith.constant 0 : i32
    %c0_i32_2 = arith.constant 0 : i32
    return %c0_i32, %arg0, %c0_i32_0, %c0_i32_1 : i32, i32, i32, i32
  }
  func.func @transform_1(%arg0: i32) -> (i32, i32) {
    %c0_i32 = arith.constant 0 : i32
    %c0_i32_0 = arith.constant 0 : i32
    %c0_i32_1 = arith.constant 0 : i32
    return %c0_i32, %c0_i32_0 : i32, i32
  }
  func.func @transform_2(%arg0: i32) -> (i32, i32) {
    %c0_i32 = arith.constant 0 : i32
    %c0_i32_0 = arith.constant 0 : i32
    %c0_i32_1 = arith.constant 0 : i32
    return %c0_i32, %c0_i32_0 : i32, i32
  }
  func.func @transform_3(%arg0: i32) -> (i32, i32, i32) {
    %c0_i32 = arith.constant 0 : i32
    %c0_i32_0 = arith.constant 0 : i32
    %c0_i32_1 = arith.constant 0 : i32
    return %arg0, %c0_i32, %c0_i32_0 : i32, i32, i32
  }
}

</mosaic_0001>

<bundles_post_ra>
// kernel: conv_attention_forward.3
= control target key start
LH: loop header
LB: loop body
LE: loop exit
PB: predicated region body
PF: predicated region fallthrough
CT: control target
= control target key end

     0   :  { %s825_s9 = smov 0   ;;  %s827_s10 = smov 0   ;;  %s993_s0 = inlined_call_operand.vmem [shape: f32[2,256,100], index: 0, kind: input, shape index: {}]   ;;  %s994_s1 = inlined_call_operand.vmem [shape: f32[100,24], index: 1, kind: input, shape index: {}]   ;;  %s995_s2 = inlined_call_operand.vmem [shape: f32[2,256,24], index: 2, kind: output, shape index: {}]  }
   0x1   :  { %s829_s11 = smov 0   ;;  %s831_s12 = smov 0  }
   0x2   :  { %s833_s13 = smov 0  }
   0x3 LB: > { %s21_s14 = sadd.s32 1, %s799_s11  ;;  %s24_s15 = sadd.s32 1, %s803_s12  ;;  %s807_s13 = sphi %s833_s13, %s12_s13   ;;  %s803_s12 = sphi %s831_s12, %s999_s12   ;;  %s799_s11 = sphi %s829_s11, %s998_s11   ;;  %s795_s10 = sphi %s827_s10, %s997_s10   ;;  %s791_s9 = sphi %s825_s9, %s996_s9  }
   0x4   : > { %p22_p0 = scmp.ge.s32.totalorder %s21_s14, 2  ;;  %p569_p1 = scmp.ge.s32.totalorder %s807_s13, 1 }
   0x5   : > { %p133_p2 = scmp.lt.s32.totalorder %s807_s13, 5 }
   0x6   : > { %s1001_s14 = smov (%p22_p0, %s21_s14), 0  ;;  %s1003_s15 = smov (!%p22_p0, %s24_s15), %s803_s12 }
   0x7   : > { %p134_p3 = pnand %p569_p1, %p133_p2  ;;  %p26_p4 = scmp.ge.s32.totalorder %s1003_s15, 2 }
   0x8   : > { %v199_v0 = vld [vmem:[%s994_s1] sm:$0xff] (!%p134_p3)  ;;  %v200_v1 = vld [vmem:[%s994_s1 + $0x8] sm:$0xff] (!%p134_p3)  ;;  %v201_v2 = vld [vmem:[%s994_s1 + $0x10] sm:$0xff] (!%p134_p3)  ;;  %s570_s22 = sshll.u32 (!%p134_p3), %s791_s9, 4  ;;  %p164_p5 = scmp.lt.s32.totalorder (!%p134_p3), %s795_s10, 1  ;;  %vm212_vm0 = vcmask (!%p134_p3), 818176  }
   0x9   : > { %s1005_s15 = smov (%p26_p4, %s1003_s15), 0  ;;  %137 = sbr.rel (%p134_p3) target bundleno = 266 (0x10a), region = 28 }
   0xa   : > { %v690_v3 = vpack.c.bf16 (!%p134_p3), %v200_v1, %v199_v0  ;;  %v202_v4 = vld [vmem:[%s994_s1 + $0x18] sm:$0xff] (!%p134_p3)  ;;  %p166_p6 = scmp.lt.s32.totalorder (!%p134_p3), %s570_s22, 31  ;;  %v203_v6 = vld [vmem:[%s994_s1 + $0x20] sm:$0xff] (!%p134_p3)  ;;  %v204_v7 = vld [vmem:[%s994_s1 + $0x28] sm:$0xff] (!%p134_p3)  ;;  %vm261_vm1 = vcmask (!%p134_p3), 1043456   ;;  %vm458_vm2 = vcmask (!%p134_p3), 195584  }
   0xb   : > { %v694_v5 = vpack.c.bf16 (!%p134_p3), %v202_v4, %v201_v2  ;;  %v698_v8 = vpack.c.bf16 (!%p134_p3), %v204_v7, %v203_v6  ;;  %v205_v9 = vld [vmem:[%s994_s1 + $0x30] sm:$0xff] (!%p134_p3)  ;;  %v206_v10 = vld [vmem:[%s994_s1 + $0x38] sm:$0xff] (!%p134_p3)  ;;  %v207_v14 = vld [vmem:[%s994_s1 + $0x40] sm:$0xff] (!%p134_p3)  ;;  %v809_v39 = vmov (!%p134_p3), 0.0  }
   0xc   : > { %691 = vmatprep.subr.bf16.mxu0 (!%p134_p3), %v690_v3  ;;  %714 = vmatprep.subr.bf16.mxu1 (!%p134_p3), %v690_v3  ;;  %v702_v13 = vpack.c.bf16 (!%p134_p3), %v206_v10, %v205_v9  ;;  %v208_v15 = vld [vmem:[%s994_s1 + $0x48] sm:$0xff] (!%p134_p3)  ;;  %v209_v17 = vld [vmem:[%s994_s1 + $0x50] sm:$0xff] (!%p134_p3)  ;;  %v210_v18 = vld [vmem:[%s994_s1 + $0x58] sm:$0xff] (!%p134_p3) }
   0xd   : > { %693 = vmatpush3.bf16.msra.mxu0 (!%p134_p3), %v690_v3  ;;  %721 = vmatpush3.bf16.msra.mxu1 (!%p134_p3), %v690_v3  ;;  %v706_v16 = vpack.c.bf16 (!%p134_p3), %v208_v15, %v207_v14  ;;  %v710_v19 = vpack.c.bf16 (!%p134_p3), %v210_v18, %v209_v17  ;;  %v211_v20 = vld [vmem:[%s994_s1 + $0x60] sm:$0xf] (!%p134_p3) }
   0xe   : > { %695 = vmatprep.subr.bf16.mxu0 (!%p134_p3), %v694_v5  ;;  %715 = vmatprep.subr.bf16.mxu1 (!%p134_p3), %v694_v5 }
  0x10   : > { %s1007_s10 = smov (!%p164_p5, %s795_s10), 1  ;;  %s1009_s22 = smov (!%p166_p6, %s570_s22), 31 }
  0x11   : > { %s571_s29 = sshll.u32 %s1007_s10, 5  ;;  %697 = vmatpush3.bf16.msra.mxu0 %v694_v5  ;;  %722 = vmatpush3.bf16.msra.mxu1 %v694_v5 }
  0x12   : > { %s876_s30 = sadd.s32 %s571_s29, %s1009_s22  ;;  %699 = vmatprep.subr.bf16.mxu0 %v698_v8  ;;  %716 = vmatprep.subr.bf16.mxu1 %v698_v8 }
  0x13   : > { %s572_s7 = sshll.u32 %s876_s30, 3 }
  0x14   : > { %s890_s10 = scalar_lea.vmem %s993_s0, %s572_s7  ;;  %s944_s28 = scalar_lea.vmem %s995_s2, %s572_s7 }
  0x15   : > { %v183_v11 = vld [vmem:[%s890_s10] sm:$0xff]  ;;  %701 = vmatpush3.bf16.msra.mxu0 %v698_v8  ;;  %723 = vmatpush3.bf16.msra.mxu1 %v698_v8  ;;  %v184_v21 = vld [vmem:[%s890_s10 + $0x8] sm:$0xff]  ;;  %v185_v23 = vld [vmem:[%s890_s10 + $0x10] sm:$0xff] }
  0x16   : > { %v191_v12 = vld [vmem:[%s890_s10 + $0x40] sm:$0xff]  ;;  %666 = vmatprep.mubr.msk.f32.mxu0 %vm212_vm0, %v183_v11  ;;  %703 = vmatprep.subr.bf16.mxu0 %v702_v13  ;;  %v192_v22 = vld [vmem:[%s890_s10 + $0x48] sm:$0xff]  ;;  %v193_v24 = vld [vmem:[%s890_s10 + $0x50] sm:$0xff] }
  0x17   : > { %678 = vmatprep.mubr.msk.f32.mxu1 %vm212_vm0, %v191_v12  ;;  %717 = vmatprep.subr.bf16.mxu1 %v702_v13  ;;  %v186_v25 = vld [vmem:[%s890_s10 + $0x18] sm:$0xff]  ;;  %v187_v27 = vld [vmem:[%s890_s10 + $0x20] sm:$0xff]  ;;  %v188_v29 = vld [vmem:[%s890_s10 + $0x28] sm:$0xff] }
  0x18   : > { %v194_v26 = vld [vmem:[%s890_s10 + $0x58] sm:$0xff]  ;;  %v195_v28 = vld [vmem:[%s890_s10 + $0x60] sm:$0xff]  ;;  %v196_v30 = vld [vmem:[%s890_s10 + $0x68] sm:$0xff] }
  0x19   : > { %705 = vmatpush3.bf16.msra.mxu0 %v702_v13  ;;  %724 = vmatpush3.bf16.msra.mxu1 %v702_v13  ;;  %v189_v31 = vld [vmem:[%s890_s10 + $0x30] sm:$0xff]  ;;  %v190_v33 = vld [vmem:[%s890_s10 + $0x38] sm:$0xff] }
  0x1a   : > { %707 = vmatprep.subr.bf16.mxu0 %v706_v16  ;;  %718 = vmatprep.subr.bf16.mxu1 %v706_v16  ;;  %v197_v32 = vld [vmem:[%s890_s10 + $0x70] sm:$0xff]  ;;  %v198_v34 = vld [vmem:[%s890_s10 + $0x78] sm:$0xff] }
  0x1d   : > { %709 = vmatpush3.bf16.msra.mxu0 %v706_v16  ;;  %725 = vmatpush3.bf16.msra.mxu1 %v706_v16 }
  0x1e   : > { %711 = vmatprep.subr.bf16.mxu0 %v710_v19  ;;  %719 = vmatprep.subr.bf16.mxu1 %v710_v19 }
  0x21   : > { %713 = vmatpush3.bf16.msra.mxu0 %v710_v19  ;;  %726 = vmatpush3.bf16.msra.mxu1 %v710_v19 }
  0x22   : > { %664 = vmatprep.subr.msk.mxu0 %vm261_vm1, %v211_v20  ;;  %720 = vmatprep.subr.msk.mxu1 %vm261_vm1, %v211_v20 }
  0x25   : > { %665 = vmatpush3.msk.msra.mxu0 %vm261_vm1, %v211_v20  ;;  %727 = vmatpush3.msk.msra.mxu1 %vm261_vm1, %v211_v20 }
  0x26   : > { %667 = vmatmul.mubr.msk.f32.vlgmr.msra.gmra.mrb[0].mxu0 %vm212_vm0, %v184_v21  ;;  %679 = vmatmul.mubr.msk.f32.vlgmr.msra.gmra.mrb[0].mxu1 %vm212_vm0, %v192_v22 }
  0x27   : > { %669 = vmatprep.mubr.msk.f32.mxu0 %vm212_vm0, %v185_v23  ;;  %681 = vmatprep.mubr.msk.f32.mxu1 %vm212_vm0, %v193_v24 }
  0x2a   : > { %670 = vmatmul.mubr.msk.f32.gmra.mrb[2].mxu0 %vm212_vm0, %v186_v25  ;;  %682 = vmatmul.mubr.msk.f32.gmra.mrb[2].mxu1 %vm212_vm0, %v194_v26 }
  0x2b   : > { %672 = vmatprep.mubr.msk.f32.mxu0 %vm212_vm0, %v187_v27  ;;  %684 = vmatprep.mubr.msk.f32.mxu1 %vm212_vm0, %v195_v28 }
  0x2e   : > { %673 = vmatmul.mubr.msk.f32.gmra.mrb[4].mxu0 %vm212_vm0, %v188_v29  ;;  %685 = vmatmul.mubr.msk.f32.gmra.mrb[4].mxu1 %vm212_vm0, %v196_v30 }
  0x2f   : > { %675 = vmatprep.mubr.msk.f32.mxu0 %vm212_vm0, %v189_v31  ;;  %687 = vmatprep.mubr.msk.f32.mxu1 %vm212_vm0, %v197_v32 }
  0x32   : > { %676 = vmatmul.mubr.msk.f32.gmra.mrb[6].mxu0 %vm212_vm0, %v190_v33  ;;  %688 = vmatmul.mubr.msk.f32.gmra.mrb[6].mxu1 %vm212_vm0, %v198_v34 }
  0xf9   : > { %v668_v35 = vpop.f32.mrb[0].mxu0  ;;  %v680_v36 = vpop.f32.mrb[0].mxu1 }
  0xfa   : > { %vm411_vm3 = vcmp.ge.f32.partialorder %v668_v35, 10.0  ;;  %vm419_vm4 = vcmp.ge.f32.partialorder %v680_v36, 10.0  ;;  %v331_v37 = vpop.f32.mrb[1].mxu0  ;;  %v371_v38 = vpop.f32.mrb[1].mxu1 }
  0xfb   : > { %v594_v40 = vsel %vm411_vm3, 1.0, %v809_v39  ;;  %v602_v41 = vsel %vm419_vm4, 1.0, %v809_v39  ;;  %vm410_vm5 = vcmp.ge.f32.partialorder %v331_v37, 10.0  ;;  %vm418_vm6 = vcmp.ge.f32.partialorder %v371_v38, 10.0 }
  0xfc   : > { %460 = vst.msk [vmem:[%s944_s28 + $0x8] sm:$0xff] %vm458_vm2, %v594_v40  ;;  %468 = vst.msk [vmem:[%s944_s28 + $0x48] sm:$0xff] %vm458_vm2, %v602_v41  ;;  %v593_v42 = vsel %vm410_vm5, 1.0, %v809_v39  ;;  %v601_v43 = vsel %vm418_vm6, 1.0, %v809_v39 }
  0xfd   : > { %459 = vst.msk [vmem:[%s944_s28] sm:$0xff] %vm458_vm2, %v593_v42  ;;  %467 = vst.msk [vmem:[%s944_s28 + $0x40] sm:$0xff] %vm458_vm2, %v601_v43  ;;  %v671_v44 = vpop.f32.mrb[2].mxu0  ;;  %v683_v45 = vpop.f32.mrb[2].mxu1 }
  0xfe   : > { %vm413_vm7 = vcmp.ge.f32.partialorder %v671_v44, 10.0  ;;  %vm421_vm8 = vcmp.ge.f32.partialorder %v683_v45, 10.0  ;;  %v341_v46 = vpop.f32.mrb[3].mxu0  ;;  %v381_v47 = vpop.f32.mrb[3].mxu1 }
  0xff   : > { %v596_v48 = vsel %vm413_vm7, 1.0, %v809_v39  ;;  %v604_v49 = vsel %vm421_vm8, 1.0, %v809_v39  ;;  %vm412_vm9 = vcmp.ge.f32.partialorder %v341_v46, 10.0  ;;  %vm420_vm10 = vcmp.ge.f32.partialorder %v381_v47, 10.0 }
 0x100   : > { %462 = vst.msk [vmem:[%s944_s28 + $0x18] sm:$0xff] %vm458_vm2, %v596_v48  ;;  %470 = vst.msk [vmem:[%s944_s28 + $0x58] sm:$0xff] %vm458_vm2, %v604_v49  ;;  %v595_v50 = vsel %vm412_vm9, 1.0, %v809_v39  ;;  %v603_v51 = vsel %vm420_vm10, 1.0, %v809_v39 }
 0x101   : > { %461 = vst.msk [vmem:[%s944_s28 + $0x10] sm:$0xff] %vm458_vm2, %v595_v50  ;;  %469 = vst.msk [vmem:[%s944_s28 + $0x50] sm:$0xff] %vm458_vm2, %v603_v51  ;;  %v674_v52 = vpop.f32.mrb[4].mxu0  ;;  %v686_v53 = vpop.f32.mrb[4].mxu1 }
 0x102   : > { %vm415_vm11 = vcmp.ge.f32.partialorder %v674_v52, 10.0  ;;  %vm423_vm12 = vcmp.ge.f32.partialorder %v686_v53, 10.0  ;;  %v351_v54 = vpop.f32.mrb[5].mxu0  ;;  %v391_v55 = vpop.f32.mrb[5].mxu1 }
 0x103   : > { %v598_v56 = vsel %vm415_vm11, 1.0, %v809_v39  ;;  %v606_v57 = vsel %vm423_vm12, 1.0, %v809_v39  ;;  %vm414_vm13 = vcmp.ge.f32.partialorder %v351_v54, 10.0  ;;  %vm422_vm14 = vcmp.ge.f32.partialorder %v391_v55, 10.0 }
 0x104   : > { %464 = vst.msk [vmem:[%s944_s28 + $0x28] sm:$0xff] %vm458_vm2, %v598_v56  ;;  %472 = vst.msk [vmem:[%s944_s28 + $0x68] sm:$0xff] %vm458_vm2, %v606_v57  ;;  %v597_v58 = vsel %vm414_vm13, 1.0, %v809_v39  ;;  %v605_v59 = vsel %vm422_vm14, 1.0, %v809_v39 }
 0x105   : > { %463 = vst.msk [vmem:[%s944_s28 + $0x20] sm:$0xff] %vm458_vm2, %v597_v58  ;;  %471 = vst.msk [vmem:[%s944_s28 + $0x60] sm:$0xff] %vm458_vm2, %v605_v59  ;;  %v677_v60 = vpop.f32.mrb[6].mxu0  ;;  %v689_v61 = vpop.f32.mrb[6].mxu1 }
 0x106   : > { %vm417_vm15 = vcmp.ge.f32.partialorder %v677_v60, 10.0  ;;  %vm425_vm0 = vcmp.ge.f32.partialorder %v689_v61, 10.0  ;;  %v361_v62 = vpop.f32.mrb[7].mxu0  ;;  %v401_v63 = vpop.f32.mrb[7].mxu1 }
 0x107   : > { %v600_v0 = vsel %vm417_vm15, 1.0, %v809_v39  ;;  %v608_v1 = vsel %vm425_vm0, 1.0, %v809_v39  ;;  %vm416_vm1 = vcmp.ge.f32.partialorder %v361_v62, 10.0  ;;  %vm424_vm3 = vcmp.ge.f32.partialorder %v401_v63, 10.0 }
 0x108   : > { %466 = vst.msk [vmem:[%s944_s28 + $0x38] sm:$0xff] %vm458_vm2, %v600_v0  ;;  %474 = vst.msk [vmem:[%s944_s28 + $0x78] sm:$0xff] %vm458_vm2, %v608_v1  ;;  %v599_v2 = vsel %vm416_vm1, 1.0, %v809_v39  ;;  %v607_v3 = vsel %vm424_vm3, 1.0, %v809_v39 }
 0x109   : > { %465 = vst.msk [vmem:[%s944_s28 + $0x30] sm:$0xff] %vm458_vm2, %v599_v2  ;;  %473 = vst.msk [vmem:[%s944_s28 + $0x70] sm:$0xff] %vm458_vm2, %v607_v3 }
 0x10a PF: > { %s12_s13 = sadd.s32 1, %s807_s13   ;;  %s996_s9 = smov %s799_s11 }
 0x10b   : > { %p9_p7 = scmp.ge.s32.totalorder %s12_s13, 6   ;;  %s997_s10 = smov %s803_s12 }
 0x10c   : > { %s998_s11 = smov %s1001_s14  ;;  %s999_s12 = smov %s1005_s15 }
 0x10d   :  { %11 = sbr.rel (!%p9_p7) target bundleno = 3 (0x3), region = 58 }

// kernel: conv_attention_forward.4
= control target key start
LH: loop header
LB: loop body
LE: loop exit
PB: predicated region body
PF: predicated region fallthrough
CT: control target
= control target key end

     0   :  { %s742_s9 = smov 0   ;;  %s744_s10 = smov 0   ;;  %s916_s0 = inlined_call_operand.vmem [shape: f32[2,100,96], index: 0, kind: input, shape index: {}]   ;;  %s917_s1 = inlined_call_operand.vmem [shape: f32[96,24], index: 1, kind: input, shape index: {}]   ;;  %s918_s2 = inlined_call_operand.vmem [shape: f32[2,100,24], index: 2, kind: output, shape index: {}]  }
   0x1   :  { %s746_s11 = smov 0  }
   0x2 LB: > { %s24_s12 = sadd.s32 1, %s718_s10  ;;  %p523_p0 = scmp.ge.s32.totalorder %s722_s11, 1  ;;  %s722_s11 = sphi %s746_s11, %s12_s11   ;;  %s718_s10 = sphi %s744_s10, %s920_s10   ;;  %s714_s9 = sphi %s742_s9, %s919_s9  }
   0x3   : > { %p26_p1 = scmp.ge.s32.totalorder %s24_s12, 2  ;;  %p133_p2 = scmp.lt.s32.totalorder %s722_s11, 3 }
   0x5   : > { %s922_s12 = smov (%p26_p1, %s24_s12), 0  ;;  %p134_p3 = pnand %p523_p0, %p133_p2 }
   0x6   : > { %v196_v0 = vld [vmem:[%s917_s1] sm:$0xff] (!%p134_p3)  ;;  %v197_v1 = vld [vmem:[%s917_s1 + $0x8] sm:$0xff] (!%p134_p3)  ;;  %v198_v2 = vld [vmem:[%s917_s1 + $0x10] sm:$0xff] (!%p134_p3)  ;;  %v724_v3 = vmov (!%p134_p3), 0.0|0.0   ;;  %vm725_vm0 = vmmov (!%p134_p3), 0   ;;  %v726_v6 = vmov (!%p134_p3), 0.0  }
   0x7   : > { %137 = sbr.rel (%p134_p3) target bundleno = 271 (0x10f), region = 28  ;;  %642 = vmatprep.subr.bf16.mxu0 (!%p134_p3), %v724_v3  ;;  %v643_v4 = vpack.c.bf16 (!%p134_p3), %v197_v1, %v196_v0  ;;  %660 = vmatprep.subr.bf16.mxu1 (!%p134_p3), %v724_v3  ;;  %v199_v5 = vld [vmem:[%s917_s1 + $0x18] sm:$0xff] (!%p134_p3)  ;;  %v200_v8 = vld [vmem:[%s917_s1 + $0x20] sm:$0xff] (!%p134_p3)  ;;  %v201_v9 = vld [vmem:[%s917_s1 + $0x28] sm:$0xff] (!%p134_p3)  ;;  %p164_p4 = scmp.lt.s32.totalorder (!%p134_p3), %s714_s9, 1  ;;  %vm208_vm1 = vcmask (!%p134_p3), 785408  }
   0x8   : > { %603 = vmatprep.mubr.msk.f32.mxu0 (!%p134_p3), %vm725_vm0, %v726_v6  ;;  %624 = vmatprep.mubr.msk.f32.mxu1 (!%p134_p3), %vm725_vm0, %v726_v6  ;;  %v646_v7 = vpack.c.bf16 (!%p134_p3), %v199_v5, %v198_v2  ;;  %v649_v10 = vpack.c.bf16 (!%p134_p3), %v201_v9, %v200_v8  ;;  %v202_v11 = vld [vmem:[%s917_s1 + $0x30] sm:$0xff] (!%p134_p3)  ;;  %v203_v12 = vld [vmem:[%s917_s1 + $0x38] sm:$0xff] (!%p134_p3)  ;;  %v204_v14 = vld [vmem:[%s917_s1 + $0x40] sm:$0xff] (!%p134_p3)  ;;  %vm417_vm2 = vcmask (!%p134_p3), 195584   ;;  %vm430_vm13 = vcmask (!%p134_p3), 191488  }
   0x9   : > { %644 = vmatpush3.bf16.msra.mxu0 (!%p134_p3), %v643_v4  ;;  %666 = vmatpush3.bf16.msra.mxu1 (!%p134_p3), %v643_v4  ;;  %v652_v13 = vpack.c.bf16 (!%p134_p3), %v203_v12, %v202_v11  ;;  %v205_v15 = vld [vmem:[%s917_s1 + $0x48] sm:$0xff] (!%p134_p3)  ;;  %v206_v17 = vld [vmem:[%s917_s1 + $0x50] sm:$0xff] (!%p134_p3)  ;;  %v207_v18 = vld [vmem:[%s917_s1 + $0x58] sm:$0xff] (!%p134_p3) }
   0xa   : > { %645 = vmatprep.subr.bf16.mxu0 (!%p134_p3), %v724_v3  ;;  %661 = vmatprep.subr.bf16.mxu1 (!%p134_p3), %v724_v3  ;;  %v655_v16 = vpack.c.bf16 (!%p134_p3), %v205_v15, %v204_v14  ;;  %v658_v19 = vpack.c.bf16 (!%p134_p3), %v207_v18, %v206_v17 }
   0xd   : > { %647 = vmatpush3.bf16.msra.mxu0 (!%p134_p3), %v646_v7  ;;  %667 = vmatpush3.bf16.msra.mxu1 (!%p134_p3), %v646_v7 }
   0xe   : > { %648 = vmatprep.subr.bf16.mxu0 %v724_v3  ;;  %662 = vmatprep.subr.bf16.mxu1 %v724_v3  ;;  %s924_s9 = smov (!%p164_p4, %s714_s9), 1 }
   0xf   : > { %s672_s13 = smul.u32 104, %s924_s9 }
  0x11   : > { %650 = vmatpush3.bf16.msra.mxu0 %v649_v10  ;;  %668 = vmatpush3.bf16.msra.mxu1 %v649_v10  ;;  %s812_s16 = scalar_lea.vmem %s916_s0, %s672_s13  ;;  %s867_s19 = scalar_lea.vmem %s918_s2, %s672_s13 }
  0x12   : > { %651 = vmatprep.subr.bf16.mxu0 %v724_v3  ;;  %663 = vmatprep.subr.bf16.mxu1 %v724_v3  ;;  %v183_v20 = vld [vmem:[%s812_s16] sm:$0xff]  ;;  %v190_v21 = vld [vmem:[%s812_s16 + $0x38] sm:$0xff]  ;;  %v184_v22 = vld [vmem:[%s812_s16 + $0x8] sm:$0xff] }
  0x13   : > { %v191_v23 = vld [vmem:[%s812_s16 + $0x40] sm:$0xff]  ;;  %v185_v24 = vld [vmem:[%s812_s16 + $0x10] sm:$0xff]  ;;  %v192_v25 = vld [vmem:[%s812_s16 + $0x48] sm:$0xff] }
  0x14   : > { %v186_v26 = vld [vmem:[%s812_s16 + $0x18] sm:$0xff]  ;;  %v193_v27 = vld [vmem:[%s812_s16 + $0x50] sm:$0xff]  ;;  %v187_v28 = vld [vmem:[%s812_s16 + $0x20] sm:$0xff] }
  0x15   : > { %653 = vmatpush3.bf16.msra.mxu0 %v652_v13  ;;  %669 = vmatpush3.bf16.msra.mxu1 %v652_v13  ;;  %v194_v29 = vld [vmem:[%s812_s16 + $0x58] sm:$0xff]  ;;  %v188_v30 = vld [vmem:[%s812_s16 + $0x28] sm:$0xff]  ;;  %v195_v31 = vld [vmem:[%s812_s16 + $0x60] sm:$0xf] }
  0x16   : > { %654 = vmatprep.subr.bf16.mxu0 %v724_v3  ;;  %664 = vmatprep.subr.bf16.mxu1 %v724_v3  ;;  %v189_v32 = vld [vmem:[%s812_s16 + $0x30] sm:$0xff] }
  0x19   : > { %656 = vmatpush3.bf16.msra.mxu0 %v655_v16  ;;  %670 = vmatpush3.bf16.msra.mxu1 %v655_v16 }
  0x1a   : > { %657 = vmatprep.subr.bf16.mxu0 %v724_v3  ;;  %665 = vmatprep.subr.bf16.mxu1 %v724_v3 }
  0x1d   : > { %659 = vmatpush3.bf16.msra.mxu0 %v658_v19  ;;  %671 = vmatpush3.bf16.msra.mxu1 %v658_v19 }
  0x20   : > { %604 = vmatmul.mubr.msk.f32.vlgmr.msra.gmra.mrb[0].mxu0 %vm208_vm1, %v183_v20  ;;  %625 = vmatmul.mubr.msk.f32.vlgmr.msra.gmra.mrb[0].mxu1 %vm208_vm1, %v190_v21 }
  0x21   : > { %606 = vmatprep.mubr.msk.f32.mxu0 %vm725_vm0, %v726_v6  ;;  %627 = vmatprep.mubr.msk.f32.mxu1 %vm725_vm0, %v726_v6 }
  0x24   : > { %607 = vmatmul.mubr.msk.f32.gmra.mrb[2].mxu0 %vm208_vm1, %v184_v22  ;;  %628 = vmatmul.mubr.msk.f32.gmra.mrb[2].mxu1 %vm208_vm1, %v191_v23 }
  0x25   : > { %609 = vmatprep.mubr.msk.f32.mxu0 %vm725_vm0, %v726_v6  ;;  %630 = vmatprep.mubr.msk.f32.mxu1 %vm725_vm0, %v726_v6 }
  0x28   : > { %610 = vmatmul.mubr.msk.f32.gmra.mrb[4].mxu0 %vm208_vm1, %v185_v24  ;;  %631 = vmatmul.mubr.msk.f32.gmra.mrb[4].mxu1 %vm208_vm1, %v192_v25 }
  0x29   : > { %612 = vmatprep.mubr.msk.f32.mxu0 %vm725_vm0, %v726_v6  ;;  %633 = vmatprep.mubr.msk.f32.mxu1 %vm725_vm0, %v726_v6 }
  0x2c   : > { %613 = vmatmul.mubr.msk.f32.gmra.mrb[6].mxu0 %vm208_vm1, %v186_v26  ;;  %634 = vmatmul.mubr.msk.f32.gmra.mrb[6].mxu1 %vm208_vm1, %v193_v27 }
  0x2d   : > { %615 = vmatprep.mubr.msk.f32.mxu0 %vm725_vm0, %v726_v6  ;;  %636 = vmatprep.mubr.msk.f32.mxu1 %vm725_vm0, %v726_v6 }
  0x30   : > { %616 = vmatmul.mubr.msk.f32.gmra.mrb[8].mxu0 %vm208_vm1, %v187_v28  ;;  %637 = vmatmul.mubr.msk.f32.gmra.mrb[8].mxu1 %vm208_vm1, %v194_v29 }
  0x31   : > { %618 = vmatprep.mubr.msk.f32.mxu0 %vm725_vm0, %v726_v6  ;;  %639 = vmatprep.mubr.msk.f32.mxu1 %vm725_vm0, %v726_v6 }
  0x34   : > { %619 = vmatmul.mubr.msk.f32.gmra.mrb[10].mxu0 %vm208_vm1, %v188_v30  ;;  %640 = vmatmul.mubr.msk.f32.gmra.mrb[10].mxu1 %vm208_vm1, %v195_v31 }
  0x35   : > { %621 = vmatprep.mubr.msk.f32.mxu0 %vm725_vm0, %v726_v6 }
  0x38   : > { %622 = vmatmul.mubr.msk.f32.gmra.mrb[12].mxu0 %vm208_vm1, %v189_v32 }
  0xf3   : > { %v314_v33 = vpop.f32.mrb[0].mxu0  ;;  %v349_v34 = vpop.f32.mrb[0].mxu1 }
  0xf4   : > { %vm378_vm3 = vcmp.ge.f32.partialorder %v314_v33, 1.0  ;;  %v605_v35 = vpop.f32.mrb[1].mxu0  ;;  %vm385_vm4 = vcmp.ge.f32.partialorder %v349_v34, 1.0  ;;  %v626_v36 = vpop.f32.mrb[1].mxu1 }
  0xf5   : > { %v539_v37 = vsel %vm378_vm3, 1.0, %v726_v6  ;;  %v546_v38 = vsel %vm385_vm4, 1.0, %v726_v6 }
  0xf6   : > { %418 = vst.msk [vmem:[%s867_s19] sm:$0xff] %vm417_vm2, %v539_v37  ;;  %425 = vst.msk [vmem:[%s867_s19 + $0x38] sm:$0xff] %vm417_vm2, %v546_v38 }
  0xf7   : > { %v319_v39 = vpop.f32.mrb[2].mxu0  ;;  %v354_v40 = vpop.f32.mrb[2].mxu1 }
  0xf8   : > { %vm379_vm5 = vcmp.ge.f32.partialorder %v319_v39, 1.0  ;;  %v608_v41 = vpop.f32.mrb[3].mxu0  ;;  %vm386_vm6 = vcmp.ge.f32.partialorder %v354_v40, 1.0  ;;  %v629_v42 = vpop.f32.mrb[3].mxu1 }
  0xf9   : > { %v540_v43 = vsel %vm379_vm5, 1.0, %v726_v6  ;;  %v547_v44 = vsel %vm386_vm6, 1.0, %v726_v6 }
  0xfa   : > { %419 = vst.msk [vmem:[%s867_s19 + $0x8] sm:$0xff] %vm417_vm2, %v540_v43  ;;  %426 = vst.msk [vmem:[%s867_s19 + $0x40] sm:$0xff] %vm417_vm2, %v547_v44 }
  0xfb   : > { %v324_v45 = vpop.f32.mrb[4].mxu0  ;;  %v359_v46 = vpop.f32.mrb[4].mxu1 }
  0xfc   : > { %vm380_vm7 = vcmp.ge.f32.partialorder %v324_v45, 1.0  ;;  %v611_v47 = vpop.f32.mrb[5].mxu0  ;;  %vm387_vm8 = vcmp.ge.f32.partialorder %v359_v46, 1.0  ;;  %v632_v48 = vpop.f32.mrb[5].mxu1 }
  0xfd   : > { %v541_v49 = vsel %vm380_vm7, 1.0, %v726_v6  ;;  %v548_v50 = vsel %vm387_vm8, 1.0, %v726_v6 }
  0xfe   : > { %420 = vst.msk [vmem:[%s867_s19 + $0x10] sm:$0xff] %vm417_vm2, %v541_v49  ;;  %427 = vst.msk [vmem:[%s867_s19 + $0x48] sm:$0xff] %vm417_vm2, %v548_v50 }
  0xff   : > { %v329_v51 = vpop.f32.mrb[6].mxu0  ;;  %v364_v52 = vpop.f32.mrb[6].mxu1 }
 0x100   : > { %vm381_vm9 = vcmp.ge.f32.partialorder %v329_v51, 1.0  ;;  %v614_v53 = vpop.f32.mrb[7].mxu0  ;;  %vm388_vm10 = vcmp.ge.f32.partialorder %v364_v52, 1.0  ;;  %v635_v54 = vpop.f32.mrb[7].mxu1 }
 0x101   : > { %v542_v55 = vsel %vm381_vm9, 1.0, %v726_v6  ;;  %v549_v56 = vsel %vm388_vm10, 1.0, %v726_v6 }
 0x102   : > { %421 = vst.msk [vmem:[%s867_s19 + $0x18] sm:$0xff] %vm417_vm2, %v542_v55  ;;  %428 = vst.msk [vmem:[%s867_s19 + $0x50] sm:$0xff] %vm417_vm2, %v549_v56 }
 0x103   : > { %v334_v57 = vpop.f32.mrb[8].mxu0  ;;  %v369_v58 = vpop.f32.mrb[8].mxu1 }
 0x104   : > { %vm382_vm11 = vcmp.ge.f32.partialorder %v334_v57, 1.0  ;;  %v617_v59 = vpop.f32.mrb[9].mxu0  ;;  %vm389_vm12 = vcmp.ge.f32.partialorder %v369_v58, 1.0  ;;  %v638_v60 = vpop.f32.mrb[9].mxu1 }
 0x105   : > { %v543_v61 = vsel %vm382_vm11, 1.0, %v726_v6  ;;  %v550_v62 = vsel %vm389_vm12, 1.0, %v726_v6 }
 0x106   : > { %422 = vst.msk [vmem:[%s867_s19 + $0x20] sm:$0xff] %vm417_vm2, %v543_v61  ;;  %429 = vst.msk [vmem:[%s867_s19 + $0x58] sm:$0xff] %vm417_vm2, %v550_v62 }
 0x107   : > { %v339_v63 = vpop.f32.mrb[10].mxu0  ;;  %v374_v0 = vpop.f32.mrb[10].mxu1 }
 0x108   : > { %vm383_vm14 = vcmp.ge.f32.partialorder %v339_v63, 1.0  ;;  %v620_v1 = vpop.f32.mrb[11].mxu0  ;;  %vm390_vm15 = vcmp.ge.f32.partialorder %v374_v0, 1.0  ;;  %v641_v2 = vpop.f32.mrb[11].mxu1 }
 0x109   : > { %v544_v3 = vsel %vm383_vm14, 1.0, %v726_v6  ;;  %v551_v4 = vsel %vm390_vm15, 1.0, %v726_v6 }
 0x10a   : > { %423 = vst.msk [vmem:[%s867_s19 + $0x28] sm:$0xff] %vm417_vm2, %v544_v3 }
 0x10b   : > { %431 = vst.msk [vmem:[%s867_s19 + $0x60] sm:$0xf] %vm430_vm13, %v551_v4  ;;  %v344_v5 = vpop.f32.mrb[12].mxu0 }
 0x10c   : > { %vm384_vm0 = vcmp.ge.f32.partialorder %v344_v5, 1.0  ;;  %v623_v7 = vpop.f32.mrb[13].mxu0 }
 0x10d   : > { %v545_v8 = vsel %vm384_vm0, 1.0, %v726_v6 }
 0x10e   : > { %424 = vst.msk [vmem:[%s867_s19 + $0x30] sm:$0xff] %vm417_vm2, %v545_v8 }
 0x10f PF: > { %s12_s11 = sadd.s32 1, %s722_s11   ;;  %s919_s9 = smov %s718_s10 }
 0x110   : > { %p9_p5 = scmp.ge.s32.totalorder %s12_s11, 4   ;;  %s920_s10 = smov %s922_s12 }
 0x112   :  { %11 = sbr.rel (!%p9_p5) target bundleno = 2 (0x2), region = 58 }

// kernel: conv_attention_forward.5
= control target key start
LH: loop header
LB: loop body
LE: loop exit
PB: predicated region body
PF: predicated region fallthrough
CT: control target
= control target key end

     0   :  { %s1004_s12 = smov 0   ;;  %s1006_s13 = smov 0   ;;  %s1143_s0 = inlined_call_operand.vmem [shape: f32[3,2,36,8], index: 0, kind: input, shape index: {}]   ;;  %s1144_s1 = inlined_call_operand.vmem [shape: f32[8,4], index: 1, kind: input, shape index: {}]   ;;  %s1145_s2 = inlined_call_operand.vmem [shape: f32[1,4], index: 2, kind: input, shape index: {}]   ;;  %s1146_s3 = inlined_call_operand.vmem [shape: f32[2,36,4], index: 3, kind: output, shape index: {}]  }
   0x1   :  { %s1008_s14 = smov 0  }
   0x2 LB: > { %s752_s15 = sadd.s32 4294967295, %s979_s14   ;;  %s1021_s16 = sadd.s32 1, %s979_s14   ;;  %s979_s14 = sphi %s1008_s14, %s1149_s14   ;;  %s975_s13 = sphi %s1006_s13, %s1148_s13   ;;  %s971_s12 = sphi %s1004_s12, %s1147_s12  }
   0x3   : > { %s17_s17 = ssub.s32 %s979_s14, %s1021_s16  ;;  %s20_s18 = sadd.s32 1, %s975_s13 }
   0x4   : > { %p18_p0 = scmp.eq.s32.totalorder %s17_s17, 0  ;;  %p27_p1 = scmp.ne.s32.totalorder %s975_s13, %s971_s12 }
   0x5   : > { %p28_p2 = scmp.eq.s32.totalorder %s979_s14, 0  ;;  %p755_p4 = scmp.ge.s32.totalorder %s979_s14, 2 }
   0x6   : > { %s1030_s19 = scalar_select %p18_p0, %s975_s13, %s20_s18  }
   0x7   : > { %p29_p3 = por %p28_p2, %p27_p1  ;;  %127 = sbr.rel (%p755_p4) target bundleno = 27 (0x1b), region = 24 }
   0xe   : > { %130 = sbr.rel (!%p29_p3) target bundleno = 27 (0x1b), region = 28  ;;  %s132_s20 = sand.u32 (%p29_p3), 1, %s975_s13  }
   0xf   : > { %s907_s21 = smul.u32 (%p29_p3), 40, %s979_s14 }
  0x10   : > { %s906_s22 = smul.u32 (%p29_p3), 120, %s132_s20 }
  0x11   : > { %s137_s25 = scalar_lea.vmem (%p29_p3), %s1143_s0, %s907_s21 }
  0x12   : > { %v193_v0 = vld [vmem:[%s137_s25] sm:$0xff] (%p29_p3)  ;;  %v195_v1 = vld [vmem:[%s137_s25 + $0x8] sm:$0xff] (%p29_p3)  ;;  %v197_v2 = vld [vmem:[%s137_s25 + $0x10] sm:$0xff] (%p29_p3)  ;;  %s134_s26 = scalar_lea.vmem (%p29_p3), [#allocation2], %s906_s22 }
  0x13   : > { %194 = vst [vmem:[%s134_s26] sm:$0xff] (%p29_p3), %v193_v0  ;;  %196 = vst [vmem:[%s134_s26 + $0x8] sm:$0xff] (%p29_p3), %v195_v1  ;;  %v199_v3 = vld [vmem:[%s137_s25 + $0x18] sm:$0xff] (%p29_p3)  ;;  %v201_v4 = vld [vmem:[%s137_s25 + $0x20] sm:$0xff] (%p29_p3) }
  0x14   : > { %198 = vst [vmem:[%s134_s26 + $0x10] sm:$0xff] (%p29_p3), %v197_v2  ;;  %v203_v5 = vld [vmem:[%s137_s25 + $0x50] sm:$0xff] (%p29_p3)  ;;  %200 = vst [vmem:[%s134_s26 + $0x18] sm:$0xff] (%p29_p3), %v199_v3  ;;  %v205_v6 = vld [vmem:[%s137_s25 + $0x58] sm:$0xff] (%p29_p3) }
  0x15   : > { %202 = vst [vmem:[%s134_s26 + $0x20] sm:$0xff] %v201_v4  ;;  %204 = vst [vmem:[%s134_s26 + $0x28] sm:$0xff] %v203_v5  ;;  %v207_v7 = vld [vmem:[%s137_s25 + $0x60] sm:$0xff]  ;;  %v209_v8 = vld [vmem:[%s137_s25 + $0x68] sm:$0xff] }
  0x16   : > { %206 = vst [vmem:[%s134_s26 + $0x30] sm:$0xff] %v205_v6  ;;  %208 = vst [vmem:[%s134_s26 + $0x38] sm:$0xff] %v207_v7  ;;  %v211_v9 = vld [vmem:[%s137_s25 + $0x70] sm:$0xff]  ;;  %v213_v10 = vld [vmem:[%s137_s25 + $0xa0] sm:$0xff] }
  0x17   : > { %210 = vst [vmem:[%s134_s26 + $0x40] sm:$0xff] %v209_v8  ;;  %v215_v11 = vld [vmem:[%s137_s25 + $0xa8] sm:$0xff]  ;;  %212 = vst [vmem:[%s134_s26 + $0x48] sm:$0xff] %v211_v9  ;;  %v217_v12 = vld [vmem:[%s137_s25 + $0xb0] sm:$0xff] }
  0x18   : > { %214 = vst [vmem:[%s134_s26 + $0x50] sm:$0xff] %v213_v10  ;;  %216 = vst [vmem:[%s134_s26 + $0x58] sm:$0xff] %v215_v11  ;;  %v219_v13 = vld [vmem:[%s137_s25 + $0xb8] sm:$0xff]  ;;  %v221_v14 = vld [vmem:[%s137_s25 + $0xc0] sm:$0xff] }
  0x19   : > { %218 = vst [vmem:[%s134_s26 + $0x60] sm:$0xff] %v217_v12  ;;  %220 = vst [vmem:[%s134_s26 + $0x68] sm:$0xff] %v219_v13 }
  0x1a   : > { %222 = vst [vmem:[%s134_s26 + $0x70] sm:$0xff] %v221_v14 }
  0x1b PF: > { %p757_p5 = scmp.ge.s32.totalorder %s979_s14, 1  ;;  %p227_p6 = scmp.lt.s32.totalorder %s979_s14, 3 }
  0x1d   : > { %p228_p7 = pnand %p757_p5, %p227_p6 }
  0x1e   : > { %s234_s27 = sand.u32 (!%p228_p7), 1, %s971_s12   ;;  %v981_v15 = vmov (!%p228_p7), 0.0|0.0   ;;  %vm284_vm0 = vcmask (!%p228_p7), 64512   ;;  %vm982_vm1 = vmmov (!%p228_p7), 0   ;;  %v983_v16 = vmov (!%p228_p7), 0.0   ;;  %p257_p8 = scmp.lt.s32.totalorder (!%p228_p7), %s752_s15, 1 }
  0x1f   : > { %231 = sbr.rel (%p228_p7) target bundleno = 872 (0x368), region = 66  ;;  %886 = vmatprep.subr.bf16.mxu0 (!%p228_p7), %v981_v15  ;;  %829 = vmatprep.mubr.msk.f32.mxu0 (!%p228_p7), %vm982_vm1, %v983_v16  ;;  %vm888_vm2 = vmpackc.low (!%p228_p7), %vm284_vm0, %vm284_vm0  ;;  %vm405_vm3 = vcmask (!%p228_p7), 293888   ;;  %vm418_vm4 = vcmask (!%p228_p7), 289792   ;;  %vm467_vm5 = vcmask (!%p228_p7), 1043456   ;;  %vm684_vm6 = vcmask (!%p228_p7), 31744  }
  0x20   : > { %s908_s28 = smul.u32 (!%p228_p7), 120, %s234_s27  ;;  %900 = vmatprep.subr.bf16.mxu1 (!%p228_p7), %v981_v15  ;;  %857 = vmatprep.mubr.msk.f32.mxu1 (!%p228_p7), %vm982_vm1, %v983_v16  ;;  %vm689_vm7 = vcmask (!%p228_p7), 27648  }
  0x22   : > { %s1045_s29 = scalar_lea.vmem (!%p228_p7), [#allocation2], %s908_s28 }
  0x23   : > { %v759_v17 = vld [vmem:[%s1045_s29 + $0x28] sm:$0xff] (!%p228_p7)  ;;  %v760_v18 = vld [vmem:[%s1045_s29 + $0x30] sm:$0xff] (!%p228_p7)  ;;  %v761_v20 = vld [vmem:[%s1045_s29 + $0x38] sm:$0xff] (!%p228_p7) }
  0x24   : > { %v887_v19 = vpack.c.bf16 (!%p228_p7), %v760_v18, %v759_v17  ;;  %v762_v21 = vld [vmem:[%s1045_s29 + $0x40] sm:$0xff] (!%p228_p7)  ;;  %v763_v24 = vld [vmem:[%s1045_s29 + $0x48] sm:$0xf] (!%p228_p7)  ;;  %v264_v28 = vld [vmem:[%s1045_s29 + $0x10] sm:$0xff] (!%p228_p7) }
  0x25   : > { %v891_v22 = vpack.c.bf16 (!%p228_p7), %v762_v21, %v761_v20  ;;  %v262_v23 = vld [vmem:[%s1045_s29] sm:$0xff] (!%p228_p7)  ;;  %v263_v26 = vld [vmem:[%s1045_s29 + $0x8] sm:$0xff] (!%p228_p7)  ;;  %v269_v29 = vmul.f32 (!%p228_p7), 0.35355338, %v264_v28  ;;  %v265_v30 = vld [vmem:[%s1045_s29 + $0x18] sm:$0xff] (!%p228_p7) }
  0x26   : > { %889 = vmatpush3.bf16.xpose.msk.msra.mxu0 %vm888_vm2, %v887_v19  ;;  %v267_v25 = vmul.f32 0.35355338, %v262_v23  ;;  %v268_v27 = vmul.f32 0.35355338, %v263_v26  ;;  %v270_v31 = vmul.f32 0.35355338, %v265_v30 }
  0x27   : > { %890 = vmatprep.subr.bf16.mxu0 %v981_v15  ;;  %v266_v32 = vld [vmem:[%s1045_s29 + $0x20] sm:$0xf]  ;;  %v764_v34 = vld [vmem:[%s1045_s29 + $0x50] sm:$0xff]  ;;  %v765_v35 = vld [vmem:[%s1045_s29 + $0x58] sm:$0xff]  ;;  %s1151_s15 = smov (!%p257_p8, %s752_s15), 1 }
  0x28   : > { %v271_v33 = vmul.f32 0.35355338, %v266_v32  ;;  %v895_v36 = vpack.c.bf16 %v765_v35, %v764_v34  ;;  %v766_v52 = vld [vmem:[%s1045_s29 + $0x60] sm:$0xff]  ;;  %v767_v53 = vld [vmem:[%s1045_s29 + $0x68] sm:$0xff]  ;;  %v768_v55 = vld [vmem:[%s1045_s29 + $0x70] sm:$0xf] }
  0x29   : > { %v898_v54 = vpack.c.bf16 %v767_v53, %v766_v52  ;;  %v571_v18 = vld [vmem:[%s1144_s1] sm:$0xff]  ;;  %s909_s5 = smul.u32 40, %s1151_s15 }
  0x2a   : > { %903 = vmatpush3.bf16.msra.mxu1 %v895_v36 }
  0x2b   : > { %901 = vmatprep.subr.bf16.mxu1 %v981_v15  ;;  %s261_s10 = scalar_lea.vmem %s1146_s3, %s909_s5 }
  0x2e   : > { %893 = vmatpush3.bf16.xpose.msk.msra.mxu0 %vm888_vm2, %v891_v22  ;;  %904 = vmatpush3.bf16.msra.mxu1 %v898_v54 }
  0x2f   : > { %827 = vmatprep.subr.mxu0 %v983_v16  ;;  %902 = vmatprep.subr.mxu1 %v983_v16 }
  0x32   : > { %905 = vmatpush3.msk.msra.mxu1 %vm467_vm5, %v768_v55 }
  0x33   : > { %869 = vmatprep.subr.mxu1 %v983_v16 }
  0x36   : > { %828 = vmatpush3.xpose.msk.msra.mxu0 %vm284_vm0, %v763_v24 }
  0x37   : > { %894 = vmatprep.subr.bf16.mxu0 %v981_v15 }
  0x39   : > { %830 = vmatmul.mubr.msk.f32.vlgmr.msra.gmra.mrb[0].mxu0 %vm284_vm0, %v267_v25 }
  0x3a   : > { %832 = vmatprep.mubr.msk.f32.mxu0 %vm982_vm1, %v983_v16  ;;  %896 = vmatpush3.bf16.msra.mxu0 %v895_v36 }
  0x3b   : > { %897 = vmatprep.subr.bf16.mxu0 %v981_v15 }
  0x3d   : > { %833 = vmatmul.mubr.msk.f32.gmra.mrb[2].mxu0 %vm284_vm0, %v268_v27 }
  0x3e   : > { %835 = vmatprep.mubr.msk.f32.mxu0 %vm982_vm1, %v983_v16  ;;  %899 = vmatpush3.bf16.msra.mxu0 %v898_v54 }
  0x3f   : > { %852 = vmatprep.subr.mxu0 %v983_v16 }
  0x41   : > { %836 = vmatmul.mubr.msk.f32.gmra.mrb[4].mxu0 %vm284_vm0, %v269_v29 }
  0x42   : > { %838 = vmatprep.mubr.msk.f32.mxu0 %vm982_vm1, %v983_v16  ;;  %853 = vmatpush3.msk.msra.mxu0 %vm467_vm5, %v768_v55 }
  0x45   : > { %839 = vmatmul.mubr.msk.f32.gmra.mrb[6].mxu0 %vm284_vm0, %v270_v31 }
  0x46   : > { %841 = vmatprep.mubr.msk.f32.mxu0 %vm982_vm1, %v983_v16 }
  0x49   : > { %842 = vmatmul.mubr.msk.f32.gmra.mrb[8].mxu0 %vm284_vm0, %v271_v33 }
  0x4a   : > { %854 = vmatprep.mubr.msk.f32.mxu0 %vm982_vm1, %v983_v16 }
 0x10c   : > { %v381_v37 = vpop.f32.mrb[0].mxu0 }
 0x10d   : > { %v831_v38 = vpop.f32.mrb[1].mxu0  ;;  %v406_v39 = vsel %vm405_vm3, %v381_v37, -inf }
 0x10e   : > { %407 = vmax.xlane.f32.xlu0 %v406_v39 }
 0x110   : > { %v386_v40 = vpop.f32.mrb[2].mxu0 }
 0x111   : > { %v834_v41 = vpop.f32.mrb[3].mxu0  ;;  %v409_v42 = vsel %vm405_vm3, %v386_v40, -inf }
 0x112   : > { %410 = vmax.xlane.f32.xlu0 %v409_v42 }
 0x114   : > { %v391_v43 = vpop.f32.mrb[4].mxu0 }
 0x115   : > { %v837_v44 = vpop.f32.mrb[5].mxu0  ;;  %v412_v45 = vsel %vm405_vm3, %v391_v43, -inf }
 0x116   : > { %413 = vmax.xlane.f32.xlu1 %v412_v45  ;;  %v785_v44 = vld [vmem:[%s1145_s2] ss:$0 sm:$0xff] }
 0x118   : > { %v396_v46 = vpop.f32.mrb[6].mxu0 }
 0x119   : > { %v840_v47 = vpop.f32.mrb[7].mxu0  ;;  %v415_v48 = vsel %vm405_vm3, %v396_v46, -inf }
 0x11a   : > { %416 = vmax.xlane.f32.xlu1 %v415_v48 }
 0x11c   : > { %v401_v49 = vpop.f32.mrb[8].mxu0 }
 0x11d   : > { %v843_v50 = vpop.f32.mrb[9].mxu0  ;;  %v419_v51 = vsel %vm418_vm4, %v401_v49, -inf }
 0x11e   : > { %420 = vmax.xlane.f32.xlu0 %v419_v51 }
 0x19b   : > { %v408_v56 = vpop.xlane.xlu0 %407 }
 0x19c   : > { %v422_v57 = vsub.f32 %v381_v37, %v408_v56 }
 0x19e   : > { %v427_v58 = vmul.f32 1.442695, %v422_v57 }
 0x19f   : > { %v411_v59 = vpop.xlane.xlu0 %410 }
 0x1a0   : > { %937 = vpow2.f32 %v427_v58  ;;  %v423_v60 = vsub.f32 %v386_v40, %v411_v59 }
 0x1a2   : > { %v429_v61 = vmul.f32 1.442695, %v423_v60 }
 0x1a3   : > { %v414_v62 = vpop.xlane.xlu1 %413 }
 0x1a4   : > { %939 = vpow2.f32 %v429_v61  ;;  %v424_v63 = vsub.f32 %v391_v43, %v414_v62 }
 0x1a6   : > { %v431_v0 = vmul.f32 1.442695, %v424_v63 }
 0x1a7   : > { %v417_v1 = vpop.xlane.xlu1 %416 }
 0x1a8   : > { %941 = vpow2.f32 %v431_v0  ;;  %v425_v2 = vsub.f32 %v396_v46, %v417_v1 }
 0x1aa   : > { %v938_v3 = vpop.eup %937  ;;  %v433_v4 = vmul.f32 1.442695, %v425_v2 }
 0x1ab   : > { %855 = vmatmul.mubr.msk.f32.vlgmr.msra.gmra.mrb[10].mxu0 %vm405_vm3, %v938_v3  ;;  %v421_v5 = vpop.xlane.xlu0 %420  ;;  %v437_v6 = vsel %vm405_vm3, %v938_v3, 0.0 }
 0x1ac   : > { %943 = vpow2.f32 %v433_v4  ;;  %v426_v7 = vsub.f32 %v401_v49, %v421_v5  ;;  %438 = vadd.xlane.f32.xlu1 %v437_v6 }
 0x1ae   : > { %v940_v8 = vpop.eup %939  ;;  %v435_v9 = vmul.f32 1.442695, %v426_v7 }
 0x1af   : > { %858 = vmatmul.mubr.msk.f32.vlgmr.msra.gmra.mrb[0].mxu1 %vm405_vm3, %v940_v8  ;;  %v440_v10 = vsel %vm405_vm3, %v940_v8, 0.0 }
 0x1b0   : > { %945 = vpow2.f32 %v435_v9  ;;  %441 = vadd.xlane.f32.xlu0 %v440_v10  ;;  %860 = vmatprep.mubr.msk.f32.mxu1 %vm982_vm1, %v983_v16 }
 0x1b1   : > { %870 = vmatpush3.msra.mxu1 %v571_v18 }
 0x1b2   : > { %v942_v11 = vpop.eup %941 }
 0x1b3   : > { %861 = vmatmul.mubr.msk.f32.gmra.mrb[2].mxu1 %vm405_vm3, %v942_v11  ;;  %v443_v12 = vsel %vm405_vm3, %v942_v11, 0.0 }
 0x1b4   : > { %444 = vadd.xlane.f32.xlu1 %v443_v12  ;;  %863 = vmatprep.mubr.msk.f32.mxu1 %vm982_vm1, %v983_v16 }
 0x1b6   : > { %v944_v13 = vpop.eup %943 }
 0x1b7   : > { %864 = vmatmul.mubr.msk.f32.gmra.mrb[4].mxu1 %vm405_vm3, %v944_v13  ;;  %v446_v14 = vsel %vm405_vm3, %v944_v13, 0.0 }
 0x1b8   : > { %447 = vadd.xlane.f32.xlu0 %v446_v14  ;;  %866 = vmatprep.mubr.msk.f32.mxu1 %vm982_vm1, %v983_v16 }
 0x1ba   : > { %v946_v15 = vpop.eup %945 }
 0x1bb   : > { %867 = vmatmul.mubr.msk.f32.gmra.mrb[6].mxu1 %vm405_vm3, %v946_v15  ;;  %v449_v17 = vsel %vm418_vm4, %v946_v15, 0.0 }
 0x1bc   : > { %450 = vadd.xlane.f32.xlu1 %v449_v17  ;;  %871 = vmatprep.mubr.msk.f32.mxu1 %vm982_vm1, %v983_v16 }
 0x239   : > { %v439_v19 = vpop.xlane.xlu1 %438 }
 0x23a   : > { %947 = vrcp.f32 %v439_v19 }
 0x23d   : > { %v442_v20 = vpop.xlane.xlu0 %441 }
 0x23e   : > { %949 = vrcp.f32 %v442_v20 }
 0x241   : > { %v445_v21 = vpop.xlane.xlu1 %444 }
 0x242   : > { %951 = vrcp.f32 %v445_v21 }
 0x244   : > { %v948_v23 = vpop.eup %947 }
 0x245   : > { %v448_v22 = vpop.xlane.xlu0 %447 }
 0x246   : > { %953 = vrcp.f32 %v448_v22 }
 0x248   : > { %v950_v28 = vpop.eup %949 }
 0x249   : > { %v451_v27 = vpop.xlane.xlu1 %450 }
 0x24a   : > { %955 = vrcp.f32 %v451_v27 }
 0x24c   : > { %v952_v32 = vpop.eup %951 }
 0x250   : > { %v954_v36 = vpop.eup %953 }
 0x254   : > { %v956_v40 = vpop.eup %955 }
 0x27e   : > { %v537_v24 = vpop.f32.mrb[10].mxu0 }
 0x27f   : > { %v566_v25 = vmul.f32 %v948_v23, %v537_v24  ;;  %v856_v26 = vpop.f32.mrb[11].mxu0 }
 0x281   : > { %872 = vmatmul.mubr.msk.f32.vlgmr.msra.gmra.mrb[8].mxu1 %vm284_vm0, %v566_v25 }
 0x282   : > { %v542_v29 = vpop.f32.mrb[0].mxu1  ;;  %874 = vmatprep.mubr.msk.f32.mxu1 %vm982_vm1, %v983_v16 }
 0x283   : > { %v567_v30 = vmul.f32 %v950_v28, %v542_v29  ;;  %v859_v31 = vpop.f32.mrb[1].mxu1 }
 0x285   : > { %875 = vmatmul.mubr.msk.f32.gmra.mrb[10].mxu1 %vm284_vm0, %v567_v30 }
 0x286   : > { %v547_v33 = vpop.f32.mrb[2].mxu1  ;;  %877 = vmatprep.mubr.msk.f32.mxu1 %vm982_vm1, %v983_v16 }
 0x287   : > { %v568_v34 = vmul.f32 %v952_v32, %v547_v33  ;;  %v862_v35 = vpop.f32.mrb[3].mxu1 }
 0x289   : > { %878 = vmatmul.mubr.msk.f32.gmra.mrb[12].mxu1 %vm284_vm0, %v568_v34 }
 0x28a   : > { %v552_v37 = vpop.f32.mrb[4].mxu1  ;;  %880 = vmatprep.mubr.msk.f32.mxu1 %vm982_vm1, %v983_v16 }
 0x28b   : > { %v569_v38 = vmul.f32 %v954_v36, %v552_v37  ;;  %v865_v39 = vpop.f32.mrb[5].mxu1 }
 0x28d   : > { %881 = vmatmul.mubr.msk.f32.gmra.mrb[14].mxu1 %vm284_vm0, %v569_v38 }
 0x28e   : > { %v557_v41 = vpop.f32.mrb[6].mxu1  ;;  %883 = vmatprep.mubr.msk.f32.mxu1 %vm982_vm1, %v983_v16 }
 0x28f   : > { %v570_v42 = vmul.f32 %v956_v40, %v557_v41  ;;  %v868_v43 = vpop.f32.mrb[7].mxu1 }
 0x291   : > { %884 = vmatmul.mubr.msk.f32.gmra.mrb[16].mxu1 %vm284_vm0, %v570_v42 }
 0x354   : > { %v660_v45 = vpop.f32.mrb[8].mxu1 }
 0x355   : > { %v661_v16 = vadd.f32 %v785_v44, %v660_v45  ;;  %v873_v46 = vpop.f32.mrb[9].mxu1 }
 0x357   : > { %685 = vst.msk [vmem:[%s261_s10] sm:$0xff] %vm684_vm6, %v661_v16 }
 0x358   : > { %v665_v47 = vpop.f32.mrb[10].mxu1 }
 0x359   : > { %v666_v48 = vadd.f32 %v785_v44, %v665_v47  ;;  %v876_v49 = vpop.f32.mrb[11].mxu1 }
 0x35b   : > { %686 = vst.msk [vmem:[%s261_s10 + $0x8] sm:$0xff] %vm684_vm6, %v666_v48 }
 0x35c   : > { %v670_v50 = vpop.f32.mrb[12].mxu1 }
 0x35d   : > { %v671_v51 = vadd.f32 %v785_v44, %v670_v50  ;;  %v879_v52 = vpop.f32.mrb[13].mxu1 }
 0x35f   : > { %687 = vst.msk [vmem:[%s261_s10 + $0x10] sm:$0xff] %vm684_vm6, %v671_v51 }
 0x360   : > { %v675_v53 = vpop.f32.mrb[14].mxu1 }
 0x361   : > { %v676_v54 = vadd.f32 %v785_v44, %v675_v53  ;;  %v882_v55 = vpop.f32.mrb[15].mxu1 }
 0x363   : > { %688 = vst.msk [vmem:[%s261_s10 + $0x18] sm:$0xff] %vm684_vm6, %v676_v54 }
 0x364   : > { %v680_v56 = vpop.f32.mrb[16].mxu1 }
 0x365   : > { %v681_v57 = vadd.f32 %v785_v44, %v680_v56  ;;  %v885_v58 = vpop.f32.mrb[17].mxu1 }
 0x367   : > { %690 = vst.msk [vmem:[%s261_s10 + $0x20] sm:$0xf] %vm689_vm7, %v681_v57 }
 0x368 PF: > { %p10_p9 = scmp.ge.s32.totalorder %s1021_s16, 4   ;;  %s1147_s12 = smov %s975_s13 }
 0x369   : > { %s1148_s13 = smov %s1030_s19  ;;  %s1149_s14 = smov %s1021_s16 }
 0x36a   :  { %12 = sbr.rel (!%p10_p9) target bundleno = 2 (0x2), region = 107 }

</bundles_post_ra>
